<compile_context>
chip_gen: v7x
topology: tpu7x:2x2x1
jax: 0.10.0
libtpu: 0.0.40
codegen_flags: <defaults>
</compile_context>

<pallas_src>
import math

import jax
import jax.numpy as jnp
from jax.experimental import pallas as pl
from jax.experimental.pallas import tpu as pltpu


def build_pe_table(d_model, max_len=1024, scale_factor=1.0, dtype=jnp.float32):
    """Deterministic buffer init, identical to the torch __init__ formula."""
    position = jnp.arange(max_len, dtype=jnp.float32)[:, None]            # (max_len, 1)
    div_term = jnp.exp(
        jnp.arange(0, d_model, 2, dtype=jnp.float32) * (-math.log(10000.0) / d_model)
    )                                                                     # (d_model//2,)
    pe = jnp.zeros((max_len, d_model), dtype=jnp.float32)
    pe = pe.at[:, 0::2].set(jnp.sin(position * div_term))
    pe = pe.at[:, 1::2].set(jnp.cos(position * div_term))
    return (scale_factor * pe).astype(dtype)                              # (max_len, D)


def _pe_add_kernel(x_ref, pe_ref, o_ref):
    # x_ref / o_ref: (tl, tlane) lane-dense tile; pe_ref: (1, tlane) row,
    # broadcast over the tl sublanes of the tile.
    o_ref[...] = x_ref[...] + pe_ref[...]


# ----------------------------------------------------------------------------
# Tiling heuristics
# ----------------------------------------------------------------------------

# Lane extent target when folding sequence rows into lanes (>= 512 and
# 128-aligned, per the lane-density recommendation).
_LANE_FOLD_TARGET = 2048


def _tile_budget_bytes():
    """Per-tile VMEM budget.

    Steady state is ~4x this (double-buffered input + output tiles) plus the
    tiny pe row, so it must stay under the scoped-VMEM default:
      v5e: 16 MiB  -> 3 MiB tiles (12 MiB steady state)
      v6e: 32 MiB  -> 6 MiB tiles (~25 MiB steady state)
      v7x: 32 MiB scoped of only 64 MiB physical -> keep 6 MiB, do NOT size
           tiles as if 128 MiB of VMEM were available.
    """
    try:
        kind = jax.devices()[0].device_kind.lower()
    except Exception:  # pragma: no cover - be conservative if query fails
        kind = ""
    if "v6" in kind or "v7" in kind:
        return 6 << 20
    return 3 << 20  # v5e / older / unknown: conservative


def _lane_fold_factor(L, bd):
    """Smallest/most useful k (dividing L) so that k*bd is a large 128-multiple.

    pe is sequence-invariant, so folding k sequence rows into the lane axis and
    tiling the pe row k times is exact.  Falls back to k=1 when L does not
    admit an exact fold (correct, just masked stores) or when bd is already big.
    """
    if bd % 128 == 0:
        k = 1                                   # already aligned; maybe grow
    else:
        if bd >= _LANE_FOLD_TARGET:
            return 1                            # big enough; only last lane block masked
        g = 128 // math.gcd(bd, 128)            # smallest k making k*bd 128-aligned
        if L % g != 0:
            return 1                            # cannot fold exactly -> fall back
        k = g
    # Grow toward the lane target while the fold stays exact.
    while (k * 2) <= L and L % (k * 2) == 0 and (k * 2) * bd <= _LANE_FOLD_TARGET:
        k *= 2
    return k


def _choose_tiles(rows, lanes, itemsize, budget, block_rows=None, block_lanes=None):
    """Pick (tl, tlane) honoring the (8,128) rule, dtype sublane packing and budget."""
    pack = max(8, 32 // itemsize)  # sublane packing: 8 f32 / 16 bf16 / 32 int8-fp8

    # --- lane tile: prefer the full lane extent (lane-dense stores); only tile
    # the lane axis when even `pack` rows of full-width lanes blow the budget.
    if block_lanes is not None:
        tlane = min(block_lanes, lanes)
    elif lanes <= 128 or lanes * min(rows, pack) * itemsize <= budget:
        tlane = lanes                                   # full extent (always legal)
    else:
        min_rows = min(rows, pack)
        tlane = budget // max(min_rows * itemsize, 1)
        tlane = max(128, (tlane // 128) * 128)          # 128-aligned chunk
        tlane = min(tlane, lanes)

    # --- row tile: fill the remaining budget, rounded to the packing multiple.
    if block_rows is not None:
        tl = min(block_rows, rows)
    else:
        tl = budget // max(tlane * itemsize, 1)
        tl = max(pack, (tl // pack) * pack)
        tl = min(tl, rows)
    return tl, tlane


# ----------------------------------------------------------------------------
# Public wrapper
# ----------------------------------------------------------------------------

def fixed_positional_encoding(x, pe_table, *, block_rows=None, block_lanes=None,
                              xla_fastpath_bytes=1 << 20, donate_x=False):
    """out[s, b, :] = x[s, b, :] + pe_table[b, :]   (eval-mode dropout = identity)."""
    L, B, D = x.shape
    bd = B * D
    itemsize = jnp.dtype(x.dtype).itemsize
    # Note: casting pe to x.dtype differs slightly from torch's bf16+f32
    # promotion (which would upcast the result); kept to preserve x.dtype out.
    pe_row = pe_table[:B, :].reshape(1, bd).astype(x.dtype)  # (1, B*D)

    # Fast path: for tiny tensors the pallas_call fixed cost dominates and
    # XLA's fused add is strictly faster.
    if x.size * itemsize < xla_fastpath_bytes:
        return (x.reshape(L, bd) + pe_row).reshape(L, B, D)

    # Lane folding: (L, B*D) -> (L//k, k*B*D) so every block's last dim is a
    # large 128-multiple (unmasked vector stores).  Free row-major reshape.
    k = _lane_fold_factor(L, bd)
    rows, lanes = L // k, k * bd
    x2 = x.reshape(rows, lanes)
    pe2 = jnp.tile(pe_row, (1, k)) if k > 1 else pe_row   # exact: pe is s-invariant

    tl, tlane = _choose_tiles(rows, lanes, itemsize, _tile_budget_bytes(),
                              block_rows, block_lanes)
    n_lane_blocks = pl.cdiv(lanes, tlane)
    n_row_blocks = pl.cdiv(rows, tl)
    # Lane axis outer so the (1, tlane) pe tile stays resident for a whole
    # row sweep (Pallas skips re-DMA when the block index is unchanged).
    grid = (n_lane_blocks, n_row_blocks)

    extra = {}
    if donate_x:
        # Caller guarantees x is dead afterwards; removes one HBM allocation.
        extra["input_output_aliases"] = {0: 0}

    out2 = pl.pallas_call(
        _pe_add_kernel,
        out_shape=jax.ShapeDtypeStruct((rows, lanes), x.dtype),
        grid=grid,
        in_specs=[
            pl.BlockSpec((tl, tlane), lambda j, i: (i, j)),  # x tile
            pl.BlockSpec((1, tlane), lambda j, i: (0, j)),   # pe row (lane-block resident)
        ],
        out_specs=pl.BlockSpec((tl, tlane), lambda j, i: (i, j)),
        compiler_params=pltpu.CompilerParams(
            # All blocks are independent: "parallel" lets v7x shard the grid
            # across its two TensorCores; neutral/harmless on v5e & v6e.
            # TODO(synk): verify on v7x that this actually shards across both
            #             TCs; if not, switch the outer axis to pltpu.CORE_PARALLEL.
            dimension_semantics=("parallel", "parallel"),
        ),
        cost_estimate=pl.CostEstimate(
            flops=L * bd,
            transcendentals=0,
            bytes_accessed=(2 * L * bd + bd) * itemsize,
        ),
        **extra,
    )(x2, pe2)
    return out2.reshape(L, B, D)


if __name__ == "__main__":
    d_model = 32
    max_len = 1024
    pe_table = build_pe_table(d_model, max_len=max_len, scale_factor=1.0)

    # 1) Small demo shape: x is [seq_len, batch, d_model] = [8, 2, 32], f32.
    #    Force the Pallas path (fastpath threshold 0) so the kernel is exercised.
    #    Lane folding turns (8, 64) into a single lane-dense (1, 512) tile.
    seq_len, batch = 8, 2
    x = jax.random.normal(jax.random.PRNGKey(0), (seq_len, batch, d_model),
                          dtype=jnp.float32)
    out = jax.block_until_ready(
        fixed_positional_encoding(x, pe_table, xla_fastpath_bytes=0))
    # Pure-JAX reference of the exact PyTorch semantics (eval-mode dropout).
    ref = x + pe_table[:batch, :][None, :, :]
    assert out.shape == x.shape and out.dtype == x.dtype
    assert jnp.allclose(out, ref, atol=1e-6, rtol=1e-6)

    # 2) Larger bf16 case exercising lane folding (k=32 -> lanes=2048) plus the
    #    2-D (lane, row) grid: block_rows=16 (bf16 sublane pack), block_lanes=512
    #    -> grid (4, 2) = 8 pipelined blocks.
    seq_len2, batch2 = 1024, 2
    x2 = jax.random.normal(jax.random.PRNGKey(1), (seq_len2, batch2, d_model),
                           dtype=jnp.bfloat16)
    out2 = jax.block_until_ready(
        fixed_positional_encoding(x2, pe_table, block_rows=16, block_lanes=512,
                                  xla_fastpath_bytes=0))
    ref2 = x2 + pe_table[:batch2, :].astype(jnp.bfloat16)[None, :, :]
    assert out2.shape == x2.shape and out2.dtype == x2.dtype
    assert jnp.allclose(out2.astype(jnp.float32), ref2.astype(jnp.float32),
                        atol=1e-2, rtol=1e-2)

    # 3) Tiny input through the default XLA fast path (pallas_call fixed cost
    #    dominates there) -- same numerics.
    out3 = jax.block_until_ready(fixed_positional_encoding(x, pe_table))
    assert jnp.allclose(out3, ref, atol=1e-6, rtol=1e-6)

    print("KERNEL_OK")
</pallas_src>

<mosaic_0001>
module attributes {stable_mosaic.version = 11 : i64} {
  func.func @_pe_add_kernel(%arg0: i32, %arg1: i32, %arg2: memref<1x512xf32, #tpu.memory_space<vmem>>, %arg3: memref<1x512xf32, #tpu.memory_space<vmem>>, %arg4: memref<1x512xf32, #tpu.memory_space<vmem>>) attributes {dimension_semantics = [#tpu.dimension_semantics<parallel>, #tpu.dimension_semantics<parallel>], iteration_bounds = array<i64: 1, 1>, scalar_prefetch = 0 : i64, scratch_operands = 0 : i64, tpu.core_type = #tpu.core_type<tc>, window_params = [{transform_indices = @transform_0, window_bounds = array<i64: 1, 512>}, {transform_indices = @transform_1, window_bounds = array<i64: 1, 512>}, {transform_indices = @transform_2, window_bounds = array<i64: 1, 512>}]} {
    %c0 = arith.constant 0 : index
    %c0_0 = arith.constant 0 : index
    %0 = vector.load %arg2[%c0, %c0_0] : memref<1x512xf32, #tpu.memory_space<vmem>>, vector<1x512xf32>
    %c0_1 = arith.constant 0 : index
    %c0_2 = arith.constant 0 : index
    %1 = vector.load %arg3[%c0_1, %c0_2] : memref<1x512xf32, #tpu.memory_space<vmem>>, vector<1x512xf32>
    %2 = arith.addf %0, %1 : vector<1x512xf32>
    %c0_3 = arith.constant 0 : index
    %c0_4 = arith.constant 0 : index
    %3 = vector.load %arg4[%c0_3, %c0_4] : memref<1x512xf32, #tpu.memory_space<vmem>>, vector<1x512xf32>
    tpu.vector_store %arg4[%c0_3, %c0_4], %2 {strides = array<i32>} : memref<1x512xf32, #tpu.memory_space<vmem>>, vector<1x512xf32>,
    return
  }
  func.func @transform_0(%arg0: i32, %arg1: i32) -> (i32, i32) {
    %c0_i32 = arith.constant 0 : i32
    return %arg1, %arg0 : i32, i32
  }
  func.func @transform_1(%arg0: i32, %arg1: i32) -> (i32, i32) {
    %c0_i32 = arith.constant 0 : i32
    %c0_i32_0 = arith.constant 0 : i32
    return %c0_i32, %arg0 : i32, i32
  }
  func.func @transform_2(%arg0: i32, %arg1: i32) -> (i32, i32) {
    %c0_i32 = arith.constant 0 : i32
    return %arg1, %arg0 : i32, i32
  }
}

</mosaic_0001>

<bundles_post_ra>
// kernel: tpu_custom_call.1
= control target key start
LH: loop header
LB: loop body
LE: loop exit
PB: predicated region body
PF: predicated region fallthrough
CT: control target
= control target key end

     0   :  { %7 = vsyncpa [#allocation3], 0  ;;  %s189_s0 = inlined_call_operand.hbm [shape: f32[1,512], index: 0, kind: input, shape index: {}]   ;;  %s190_s1 = inlined_call_operand.hbm [shape: f32[1,512], index: 1, kind: input, shape index: {}]   ;;  %s191_s2 = inlined_call_operand.hbm [shape: f32[1,512], index: 2, kind: output, shape index: {}]  }
   0x1   :  { %8 = vsyncpa [#allocation6], 0 }
   0x2   :  { %9 = vsyncpa [#allocation4], 0  ;;  %s135_s9 = smov [#allocation2]   ;;  %s136_s11 = smov [#allocation5]  }
   0x3   :  { %s16_s10 = sshll.u32 %s135_s9, 4  ;;  %s26_s12 = sshll.u32 %s136_s11, 4  ;;  %s17_s10 = int_to_ptr.vmem [resolvable:$true] %s16_s10  ;;  %s27_s12 = int_to_ptr.vmem [resolvable:$true] %s26_s12 }
   0x4   :  { %s63_s15 = scalar_lea.hbm %s189_s0, 64 }
   0x5   :  { %p64_p0 = scmp.ne.s32.totalorder %s189_s0, %s63_s15  ;;  %p67_p1 = scmp.lt.u32.totalorder %s63_s15, %s189_s0 }
   0x7   :  { %p69_p2 = pnand %p67_p1, %p64_p0 }
   0x9   :  { %72 = shalt.err (!%p69_p2)
}
   0xa   :  { %s73_s20 = scalar_lea.vmem %s17_s10, 64  ;;  %p78_p4 = scmp.lt.s32.totalorder %s17_s10, %s17_s10 }
   0xb   :  { %p74_p3 = scmp.ne.s32.totalorder %s17_s10, %s73_s20  ;;  %p79_p5 = scmp.lt.s32.totalorder %s73_s20, %s73_s20 }
   0xd   :  { %p80_p6 = por %p79_p5, %p78_p4 }
   0xf   :  { %p81_p7 = pnand %p80_p6, %p74_p3 }
  0x11   :  { %84 = shalt.err (!%p81_p7)
}
  0x12   :  { %19 = dma.hbm_to_vmem [thread:$0]  %s189_s0, 64, %s17_s10, [#allocation3]  }
  0x13   :  { %s85_s25 = scalar_lea.hbm %s190_s1, 64 }
  0x14   :  { %p86_p8 = scmp.ne.s32.totalorder %s190_s1, %s85_s25  ;;  %p89_p9 = scmp.lt.u32.totalorder %s85_s25, %s190_s1 }
  0x16   :  { %p91_p10 = pnand %p89_p9, %p86_p8 }
  0x18   :  { %94 = shalt.err (!%p91_p10)
}
  0x19   :  { %s95_s30 = scalar_lea.vmem %s27_s12, 64  ;;  %p100_p12 = scmp.lt.s32.totalorder %s27_s12, %s27_s12 }
  0x1a   :  { %p96_p11 = scmp.ne.s32.totalorder %s27_s12, %s95_s30  ;;  %p101_p13 = scmp.lt.s32.totalorder %s95_s30, %s95_s30 }
  0x1c   :  { %p102_p0 = por %p101_p13, %p100_p12 }
  0x1e   :  { %p103_p1 = pnand %p102_p0, %p96_p11 }
  0x20   :  { %106 = shalt.err (!%p103_p1)
}
  0x21   :  { %29 = dma.hbm_to_vmem [thread:$0]  %s190_s1, 64, %s27_s12, [#allocation6]  }
  0x22   :  { %129 = dma.done.wait [#allocation3], 64  }
  0x23   :  { %130 = vsyncadd [#allocation3], 4294967232 }
  0x24   :  { %131 = dma.done.wait [#allocation6], 64  }
  0x25   :  { %132 = vsyncadd [#allocation6], 4294967232  ;;  %v39_v0 = vlaneseq  ;;  %s137_s4 = smov [#allocation7]   ;;  %v36_v1 = vld [vmem:[#allocation2] sm:$0xf] }
  0x26   :  { %s50_s5 = sshll.u32 %s137_s4, 4  ;;  %v37_v2 = vld [vmem:[#allocation5] sm:$0xf]  ;;  %s51_s5 = int_to_ptr.vmem [resolvable:$true] %s50_s5 }
  0x27   :  { %vm41_vm0 = vcmp.lt.s32.totalorder %v39_v0, 512  ;;  %v38_v3 = vadd.f32 %v37_v2, %v36_v1  ;;  %s107_s6 = scalar_lea.vmem %s51_s5, 64  ;;  %p112_p3 = scmp.lt.s32.totalorder %s51_s5, %s51_s5 }
  0x28   :  { %p108_p2 = scmp.ne.s32.totalorder %s51_s5, %s107_s6  ;;  %p113_p4 = scmp.lt.s32.totalorder %s107_s6, %s107_s6 }
  0x29   :  { %43 = vst.msk [vmem:[#allocation7] sm:$0xf] %vm41_vm0, %v38_v3 }
  0x2a   :  { %p114_p5 = por %p113_p4, %p112_p3 }
  0x2c   :  { %p115_p6 = pnand %p114_p5, %p108_p2 }
  0x2e   :  { %118 = shalt.err (!%p115_p6)
}
  0x2f   :  { %s119_s8 = scalar_lea.hbm %s191_s2, 64 }
  0x30   :  { %p120_p7 = scmp.ne.s32.totalorder %s191_s2, %s119_s8  ;;  %p123_p8 = scmp.lt.u32.totalorder %s119_s8, %s191_s2 }
  0x32   :  { %p125_p9 = pnand %p123_p8, %p120_p7 }
  0x34   :  { %128 = shalt.err (!%p125_p9)
}
  0x35   :  { %53 = dma.vmem_to_hbm [thread:$0]  %s51_s5, 64, %s191_s2, [#allocation4]  }
  0x36   :  { %133 = dma.done.wait [#allocation4], 64  }
  0x37   :  { %134 = vsyncadd [#allocation4], 4294967232 }
  0x38   :  { %57 = vsyncpa [#allocation3], 1 }
  0x39   :  { %58 = vsyncpa [#allocation6], 1 }
  0x3a   :  { %59 = vsyncpa [#allocation4], 1 }

</bundles_post_ra>
